<compile_context>
chip_gen: v7x
topology: tpu7x:2x2x1
jax: 0.10.0
libtpu: 0.0.40
codegen_flags: <defaults>
</compile_context>

<pallas_src>
import numpy as np
import jax
import jax.numpy as jnp
from jax.experimental import pallas as pl
from jax.experimental.pallas import tpu as pltpu


def _round_up(x: int, m: int) -> int:
    return (x + m - 1) // m * m


def _cdiv(a: int, b: int) -> int:
    return (a + b - 1) // b


def _vmem_budget_bytes() -> int:
    """Per-generation VMEM budget for this kernel (conservative)."""
    default_capacity = 64 << 20          # safe for every generation (v7x = 64 MiB)
    try:
        info = pltpu.get_tpu_info()
        cap = int(getattr(info, "vmem_capacity_bytes", 0)) or default_capacity
    except Exception:
        cap = default_capacity
    # Use at most half of physical VMEM for this kernel's working set;
    # the rest is headroom for compiler-internal scratch / other fusions.
    return min(cap, 128 << 20) // 2


def _fused_embed_kernel(tok_ref, w_ref, out_ref):
    # tok_ref: (TB, S) int32  -- token ids already offset by slot*V_pad
    # w_ref  : (K, N)  bf16   -- block-diagonal stacked embedding tables
    # out_ref: (TB, N) bf16   -- lane-dense output slab (N multiple of 128)
    tb, s_slots = tok_ref.shape
    k = w_ref.shape[0]

    tok = tok_ref[...]                                        # (TB, S) int32
    # (1, K) lane iota; the compares broadcast against (TB, 1) token columns,
    # avoiding a (TB, K) int32 temporary.
    iota = jax.lax.broadcasted_iota(jnp.int32, (1, k), 1)     # (1, K) int32

    # One compare per slot (static unroll, S is small); OR them together.
    # Blocks in the concatenated vocab space are disjoint, so the OR is an
    # exact multi-hot with one 1 per slot.
    hit = None
    for s in range(s_slots):
        col = jax.lax.slice(tok, (0, s), (tb, s + 1))         # (TB, 1) int32
        m = iota == col                                       # (TB, K) bool
        hit = m if hit is None else jnp.logical_or(hit, m)
    # TODO(synk): if bundle dumps show the VALU slot saturating for large S,
    # collapse the compare/OR chain into one compare against a lane-repeated
    # token vector (XLU repeat) instead.

    # Direct bool->bf16 cast (no select pass); MXU runs in its native dtype.
    onehot = hit.astype(jnp.bfloat16)                         # (TB, K) bf16

    acc = jnp.dot(onehot, w_ref[...], preferred_element_type=jnp.float32)
    out_ref[...] = acc.astype(out_ref.dtype)                  # exact downcast


def pack_block_diag_tables(tables, dtype=jnp.bfloat16):
    """Pack per-slot embedding tables [(V_i, E), ...] into one block-diagonal
    (K, N) matrix with K = S * V_pad and N = round_up(S*E, 128).

    V_pad is rounded up from max(V_i) + 1 so every slot has at least one
    trailing all-zero row (used as the target for invalid token ids)."""
    s_slots = len(tables)
    embed_dim = int(tables[0].shape[1])
    v_pad = _round_up(max(int(t.shape[0]) for t in tables) + 1, 8)
    n = _round_up(s_slots * embed_dim, 128)

    w = jnp.zeros((s_slots * v_pad, n), dtype=dtype)
    for s, t in enumerate(tables):
        v_s = int(t.shape[0])
        w = w.at[s * v_pad:s * v_pad + v_s,
                 s * embed_dim:(s + 1) * embed_dim].set(t.astype(dtype))
    return w, v_pad


def _pick_tile_b(b, s_slots, k, n, out_bytes, table_bytes, budget_bytes):
    """Largest batch tile that fits the VMEM budget, with >=2 grid steps when
    the batch allows (v7x megacore) and a preference for tiles dividing b."""
    per_row = (2 * n * out_bytes        # double-buffered output block
               + 2 * s_slots * 4        # double-buffered token block
               + k * 2 + k * 4          # bf16 one-hot + int/bool temporaries
               + n * 4)                 # f32 matmul accumulator
    avail = budget_bytes - table_bytes
    if avail < 8 * per_row:
        raise ValueError(
            "Packed embedding table does not fit the per-generation VMEM "
            f"budget (table={table_bytes} B, budget={budget_bytes} B). "
            "Use the HBM-resident gather path instead. "
            "# TODO(synk): gather path not implemented.")
    tb_max = max(8, min(1024, (avail // per_row) // 8 * 8))
    # >=2 grid steps when possible so v7x's 2nd TensorCore is not idle.
    tb = min(tb_max, max(8, _round_up(_cdiv(b, 2), 8)))
    # Prefer a tile that divides b -> no batch padding, no post-kernel slice
    # copy (only shrink up to 2x for this).
    if b % tb:
        for cand in range(tb - 8, max(8, tb // 2) - 1, -8):
            if cand >= 8 and b % cand == 0:
                tb = cand
                break
    per_step_bytes = table_bytes + tb * per_row
    return tb, per_step_bytes


def multi_discrete_embedding(tokens, w_packed, *, embed_dim, v_pad,
                             out_dtype=jnp.bfloat16):
    """tokens: int array (..., S); w_packed: (S*v_pad, N) block-diagonal table.

    Returns an array of shape (..., S, embed_dim) and dtype `out_dtype`
    (default bf16 -- exact, since the matmul only selects bf16 table rows).

    NOTE: token ids outside [0, vocab_size_i) yield all-zero rows (PyTorch's
    nn.Embedding would raise an index error instead); negative / too-large ids
    are remapped to the zero padding row of their own slot.
    """
    assert tokens.ndim >= 2, f"Got only {tokens.ndim} dimensions."
    *lead, s_slots = tokens.shape
    k, n = w_packed.shape
    assert k == s_slots * v_pad, (k, s_slots, v_pad)
    assert n >= s_slots * embed_dim
    assert n % 128 == 0, "packed table must be lane-padded"

    out_bytes = jnp.dtype(out_dtype).itemsize
    table_bytes = k * n * w_packed.dtype.itemsize
    budget = _vmem_budget_bytes()

    b = int(np.prod(lead)) if lead else 1
    tok2d = tokens.reshape(b, s_slots).astype(jnp.int32)
    # Invalid ids (negative or >= v_pad) -> last padding row of the slot
    # (always zero by construction), so they cannot leak into another slot.
    tok2d = jnp.where((tok2d < 0) | (tok2d >= v_pad), v_pad - 1, tok2d)
    # Offset each slot into its block of the concatenated vocab space.
    offsets = (jnp.arange(s_slots, dtype=jnp.int32) * v_pad)[None, :]
    tok_off = tok2d + offsets

    tb, per_step_bytes = _pick_tile_b(
        b, s_slots, k, n, out_bytes, table_bytes, budget)
    b_pad = _round_up(b, tb)
    if b_pad != b:
        tok_off = jnp.pad(tok_off, ((0, b_pad - b), (0, 0)))

    # Explicit scoped-VMEM limit: footprint + headroom (defaults are only
    # 16/32 MiB and would gate larger tiles); stays under v7x's 64 MiB.
    vmem_limit = min(max(32 << 20, per_step_bytes + (8 << 20)), 112 << 20)

    out = pl.pallas_call(
        _fused_embed_kernel,
        out_shape=jax.ShapeDtypeStruct((b_pad, n), out_dtype),
        grid=(b_pad // tb,),
        in_specs=[
            # slot tokens for this batch tile only (batch-major, sublane ids)
            pl.BlockSpec((tb, s_slots), lambda i: (i, 0)),
            # whole block-diagonal table resident in VMEM: copied once,
            # not pipelined, no second (double) buffer.
            pl.BlockSpec(memory_space=pltpu.MemorySpace.VMEM),
        ],
        # lane-dense (TB, N) output tile, written in final layout
        out_specs=pl.BlockSpec((tb, n), lambda i: (i, 0)),
        compiler_params=pltpu.CompilerParams(
            dimension_semantics=("parallel",),
            vmem_limit_bytes=int(vmem_limit),
        ),
    )(tok_off, w_packed)

    # No-op slices when b_pad == b and N == S*E (preferred configuration:
    # keep S*E a multiple of 128 and pick tile_b dividing b); otherwise this
    # is one extra pass over the output outside the kernel.
    out = out[:b, :s_slots * embed_dim]
    return out.reshape(*lead, s_slots, embed_dim)


if __name__ == "__main__":
    key = jax.random.PRNGKey(0)
    k_tab, k_tok = jax.random.split(key)

    vocab_sizes = [7, 11, 5, 13]          # S = 4 independent vocabularies
    embed_dim = 32                        # S * E = 128 -> already lane-dense
    batch, seq = 2, 8                     # tokens shape (2, 8, 4)

    # Per-slot embedding weights; bf16 is the canonical stored dtype here.
    tab_keys = jax.random.split(k_tab, len(vocab_sizes))
    tables = [
        jax.random.normal(tab_keys[i], (int(v), embed_dim), dtype=jnp.float32)
        .astype(jnp.bfloat16)
        for i, v in enumerate(vocab_sizes)
    ]
    w_packed, v_pad = pack_block_diag_tables(tables)

    # Sample valid token ids per slot (each slot bounded by its own vocab).
    cols = []
    tok_keys = jax.random.split(k_tok, len(vocab_sizes))
    for i, v in enumerate(vocab_sizes):
        cols.append(
            jax.random.randint(tok_keys[i], (batch, seq, 1), 0, int(v),
                               dtype=jnp.int32)
        )
    tokens = jnp.concatenate(cols, axis=-1)  # (2, 8, 4) int32

    out = multi_discrete_embedding(tokens, w_packed,
                                   embed_dim=embed_dim, v_pad=v_pad)
    out = jax.block_until_ready(out)
    assert out.shape == (batch, seq, len(vocab_sizes), embed_dim), out.shape
    assert out.dtype == jnp.bfloat16, out.dtype

    # Pure-JAX reference: gather per slot (same bf16 weights), stack on dim=-2.
    # One-hot selection of bf16 rows is exact, so bf16 output == f32 reference.
    ref = jnp.stack(
        [jnp.take(tables[i].astype(jnp.float32), tokens[..., i], axis=0)
         for i in range(len(vocab_sizes))],
        axis=-2,
    )
    assert np.allclose(np.asarray(out.astype(jnp.float32)), np.asarray(ref),
                       atol=1e-6), "mismatch vs reference"

    print("KERNEL_OK")
</pallas_src>

<mosaic_0001>
module attributes {stable_mosaic.version = 11 : i64} {
  func.func @_fused_embed_kernel(%arg0: i32, %arg1: memref<8x4xi32, #tpu.memory_space<vmem>>, %arg2: memref<64x128xbf16, #tpu.memory_space<vmem>>, %arg3: memref<8x128xbf16, #tpu.memory_space<vmem>>) attributes {dimension_semantics = [#tpu.dimension_semantics<parallel>], iteration_bounds = array<i64: 2>, scalar_prefetch = 0 : i64, scratch_operands = 0 : i64, tpu.core_type = #tpu.core_type<tc>, window_params = [{transform_indices = @transform_0, window_bounds = array<i64: 8, 4>}, {pipeline_mode = #tpu.pipeline_mode<synchronous>, transform_indices = @transform_1, window_bounds = array<i64: 64, 128>}, {transform_indices = @transform_2, window_bounds = array<i64: 8, 128>}]} {
    %c0 = arith.constant 0 : index
    %c0_0 = arith.constant 0 : index
    %0 = vector.load %arg1[%c0, %c0_0] : memref<8x4xi32, #tpu.memory_space<vmem>>, vector<8x4xi32>
    %1 = tpu.iota {dimensions = array<i32: 1>} : vector<1x64xi32>
    %2 = vector.extract_strided_slice %0 {offsets = [0, 0], sizes = [8, 1], strides = [1, 1]} : vector<8x4xi32> to vector<8x1xi32>
    %3 = vector.broadcast %1 : vector<1x64xi32> to vector<8x64xi32>
    %4 = vector.broadcast %2 : vector<8x1xi32> to vector<8x64xi32>
    %5 = arith.cmpi eq, %3, %4 : vector<8x64xi32>
    %6 = vector.extract_strided_slice %0 {offsets = [0, 1], sizes = [8, 1], strides = [1, 1]} : vector<8x4xi32> to vector<8x1xi32>
    %7 = vector.broadcast %1 : vector<1x64xi32> to vector<8x64xi32>
    %8 = vector.broadcast %6 : vector<8x1xi32> to vector<8x64xi32>
    %9 = arith.cmpi eq, %7, %8 : vector<8x64xi32>
    %10 = arith.ori %5, %9 : vector<8x64xi1>
    %11 = vector.extract_strided_slice %0 {offsets = [0, 2], sizes = [8, 1], strides = [1, 1]} : vector<8x4xi32> to vector<8x1xi32>
    %12 = vector.broadcast %1 : vector<1x64xi32> to vector<8x64xi32>
    %13 = vector.broadcast %11 : vector<8x1xi32> to vector<8x64xi32>
    %14 = arith.cmpi eq, %12, %13 : vector<8x64xi32>
    %15 = arith.ori %10, %14 : vector<8x64xi1>
    %16 = vector.extract_strided_slice %0 {offsets = [0, 3], sizes = [8, 1], strides = [1, 1]} : vector<8x4xi32> to vector<8x1xi32>
    %17 = vector.broadcast %1 : vector<1x64xi32> to vector<8x64xi32>
    %18 = vector.broadcast %16 : vector<8x1xi32> to vector<8x64xi32>
    %19 = arith.cmpi eq, %17, %18 : vector<8x64xi32>
    %20 = arith.ori %15, %19 : vector<8x64xi1>
    %21 = arith.extui %20 : vector<8x64xi1> to vector<8x64xi32>
    %22 = arith.sitofp %21 : vector<8x64xi32> to vector<8x64xf32>
    %23 = arith.truncf %22 : vector<8x64xf32> to vector<8x64xbf16>
    %c0_1 = arith.constant 0 : index
    %c0_2 = arith.constant 0 : index
    %24 = vector.load %arg2[%c0_1, %c0_2] : memref<64x128xbf16, #tpu.memory_space<vmem>>, vector<64x128xbf16>
    %cst = arith.constant dense<0.000000e+00> : vector<8x128xf32>
    %25 = tpu.matmul %23, %24, %cst {dimension_numbers = #tpu.dot_dimension_numbers<[1], [0], [0], [1], [0, 0, 1, 1], [], []>} : vector<8x64xbf16>, vector<64x128xbf16>, vector<8x128xf32> -> vector<8x128xf32>
    %26 = arith.truncf %25 : vector<8x128xf32> to vector<8x128xbf16>
    %c0_3 = arith.constant 0 : index
    %c0_4 = arith.constant 0 : index
    %27 = vector.load %arg3[%c0_3, %c0_4] : memref<8x128xbf16, #tpu.memory_space<vmem>>, vector<8x128xbf16>
    tpu.vector_store %arg3[%c0_3, %c0_4], %26 {strides = array<i32>} : memref<8x128xbf16, #tpu.memory_space<vmem>>, vector<8x128xbf16>,
    return
  }
  func.func @transform_0(%arg0: i32) -> (i32, i32) {
    %c0_i32 = arith.constant 0 : i32
    %c0_i32_0 = arith.constant 0 : i32
    return %arg0, %c0_i32 : i32, i32
  }
  func.func @transform_1(%arg0: i32) -> (i32, i32) {
    %c0_i32 = arith.constant 0 : i32
    %c0_i32_0 = arith.constant 0 : i32
    %c0_i32_1 = arith.constant 0 : i32
    return %c0_i32, %c0_i32_0 : i32, i32
  }
  func.func @transform_2(%arg0: i32) -> (i32, i32) {
    %c0_i32 = arith.constant 0 : i32
    %c0_i32_0 = arith.constant 0 : i32
    return %arg0, %c0_i32 : i32, i32
  }
}

</mosaic_0001>

<bundles_post_ra>
// kernel: tpu_custom_call.1
= control target key start
LH: loop header
LB: loop body
LE: loop exit
PB: predicated region body
PF: predicated region fallthrough
CT: control target
= control target key end

     0   :  { %7 = vsyncpa [#allocation3], 0  ;;  %s701_s0 = inlined_call_operand.vmem [shape: s32[16,4], index: 0, kind: input, shape index: {}]   ;;  %s702_s1 = inlined_call_operand.hbm [shape: bf16[64,128], index: 1, kind: input, shape index: {}]   ;;  %s703_s2 = inlined_call_operand.hbm [shape: bf16[16,128], index: 2, kind: output, shape index: {}]  }
   0x1   :  { %8 = vsyncpa [#allocation4], 0 }
   0x2   :  { %10 = vsyncpa [#allocation4 + $0x1], 0  ;;  %s566_s9 = smov 0   ;;  %s568_s10 = smov 0  }
   0x3   :  { %s570_s11 = smov 0   ;;  %s572_s12 = smov 0  }
   0x4 LB: > { %s587_s13 = sadd.s32 4294967295, %s539_s12   ;;  %s343_s14 = sadd.s32 4294967294, %s539_s12   ;;  %s539_s12 = sphi %s572_s12, %s719_s12   ;;  %s535_s11 = sphi %s570_s11, %s718_s11   ;;  %s531_s10 = sphi %s568_s10, %s717_s10   ;;  %s527_s9 = sphi %s566_s9, %s716_s9  }
   0x5   : > { %s591_s15 = sadd.s32 1, %s539_s12   ;;  %s70_s16 = sadd.s32 1, %s535_s11 }
   0x6   : > { %s67_s17 = ssub.s32 %s539_s12, %s591_s15  ;;  %p80_p0 = scmp.ne.s32.totalorder %s535_s11, %s531_s10 }
   0x7   : > { %p68_p1 = scmp.eq.s32.totalorder %s67_s17, 0  ;;  %p81_p2 = scmp.eq.s32.totalorder %s587_s13, 1 }
   0x8   : > { %p86_p3 = scmp.ne.s32.totalorder %s531_s10, %s527_s9  ;;  %p87_p4 = scmp.eq.s32.totalorder %s343_s14, 1 }
   0x9   : > { %s602_s18 = scalar_select %p68_p1, %s535_s11, %s70_s16  }
   0xa   : > { %p604_p5 = por %p81_p2, %p80_p0  ;;  %p608_p6 = por %p87_p4, %p86_p3 }
   0xb   : > { %p344_p7 = scmp.ge.s32.totalorder %s539_s12, 1  ;;  %p94_p8 = scmp.lt.s32.totalorder %s539_s12, 3 }
   0xc   : > { %s707_s19 = scalar_select %p604_p5, 1, 0 }
   0xd   : > { %s708_s20 = scalar_select %p608_p6, 1, 0 }
   0xe   : > { %p704_p9 = scmp.eq.s32.totalorder %s587_s13, 0  ;;  %p615_p10 = pnand %p344_p7, %p94_p8 }
   0xf   : > { %s541_s22 = smov [#allocation2]   ;;  %s445_s27 = scalar_lea.hbm %s702_s1, 512 }
  0x10   : > { %s709_s21 = scalar_select %p615_p10, 1, 0 }
  0x11   : > { %s106_s23 = sshll.u32 %s541_s22, 4  ;;  %p384_p11 = pneg %p615_p10  ;;  %s107_s23 = int_to_ptr.vmem [resolvable:$true] %s106_s23 }
  0x12   : > { %p446_p13 = scmp.ne.s32.totalorder %s702_s1, %s445_s27  ;;  %p452_p3 = scmp.lt.u32.totalorder %s445_s27, %s702_s1 }
  0x13   : > { %p623_p12 = pnand %p704_p9, %p384_p11 }
  0x15   : > { %p447_p0 = pneg %p623_p12 }
  0x17   : > { %p448_p1 = pnand %p447_p0, %p446_p13 }
  0x19   : > { %p449_p2 = pneg %p448_p1 }
  0x1b   : > { %p454_p4 = pnand %p452_p3, %p449_p2 }
  0x1d   : > { %457 = shalt.err (!%p454_p4)
}
  0x1e   : > { %s458_s4 = scalar_lea.vmem %s107_s23, 512  ;;  %p466_p9 = scmp.lt.s32.totalorder %s107_s23, %s107_s23 }
  0x1f   : > { %p459_p7 = scmp.ne.s32.totalorder %s107_s23, %s458_s4  ;;  %p467_p6 = scmp.lt.s32.totalorder %s458_s4, %s458_s4 }
  0x21   : > { %p461_p8 = pnand %p459_p7, %p447_p0  ;;  %p468_p5 = por %p467_p6, %p466_p9 }
  0x23   : > { %p462_p11 = pneg %p461_p8 }
  0x25   : > { %p469_p10 = pnand %p468_p5, %p462_p11 }
  0x27   : > { %472 = shalt.err (!%p469_p10)
}
  0x28   : > { %s542_s5 = smov 64   ;;  %s543_s6 = smov 4  }
  0x29   : > { %387 = dma.hbm_to_vmem [thread:$0]  (!%p623_p12), %s702_s1, 512, %s107_s23, [#allocation3], %s542_s5, %s542_s5, %s543_s6  }
  0x2a   : > { %p711_p13 = scmp.ne.s32.totalorder %s709_s21, 0 }
  0x2b   : > { %p712_p1 = scmp.eq.s32.totalorder (!%p711_p13), %s587_s13, 0 }
  0x2c   : > { %129 = sbr.rel (%p711_p13) target bundleno = 427 (0x1ab), region = 28 }
  0x33   : > { %518 = dma.done.wait (%p712_p1), [#allocation3], 512   ;;  %p713_p0 = pmov %p712_p1 }
  0x34   : > { %p150_p5 = scmp.lt.s32.totalorder %s587_s13, 1  ;;  %v544_v0 = vmov 0   ;;  %v545_v1 = vmov 2   ;;  %v546_v2 = vmov 0.0   ;;  %v441_v4 = vld [vmem:[#allocation2] sm:$0xff]   ;;  %v442_v5 = vld [vmem:[#allocation2 + $0x8] sm:$0xff]   ;;  %v156_v10 = vlaneseq }
  0x35   : > { %520 = vsyncadd (%p713_p0), [#allocation3], 4294966784  ;;  %436 = vset.pattern.permute.xlu0 %v544_v0  ;;  %438 = vset.pattern.permute.xlu1 %v545_v1  ;;  %v547_v6 = vmov 1   ;;  %v548_v7 = vmov 3   ;;  %v443_v8 = vld [vmem:[#allocation2 + $0x10] sm:$0xff]   ;;  %v444_v9 = vld [vmem:[#allocation2 + $0x18] sm:$0xff]  }
  0x36   : > { %s151_s14 = scalar_select %p150_p5, %s587_s13, 1  ;;  %366 = vmatprep.subr.bf16.mxu0 %v546_v2  ;;  %vm549_vm0 = vmmov 0   ;;  %v157_v13 = vand.u32 127, %v156_v10  ;;  %vm212_vm8 = vcmask 523264  }
  0x37   : > { %367 = vmatpush3.bf16.msra.mxu0 %v441_v4  ;;  %374 = vmatprep.mubr.msk.bf16.mxu0 %vm549_vm0, %v546_v2  ;;  %s147_s23 = sand.u32 1, %s531_s10   ;;  %s358_s25 = sshll.u32 %s587_s13, 6 }
  0x38   : > { %s350_s16 = sshll.u32 %s151_s14, 3  ;;  %368 = vmatprep.subr.bf16.mxu0 %v546_v2  ;;  %s349_s24 = sshll.u32 %s147_s23, 2 }
  0x39   : > { %s153_s22 = scalar_lea.vmem %s701_s0, %s350_s16  ;;  %s149_s26 = scalar_lea.vmem [#allocation5], %s349_s24 }
  0x3a   : > { %v155_v3 = vld [vmem:[%s153_s22] sm:$0xff]  ;;  %s272_s27 = sshll.u32 %s149_s26, 4  ;;  %s659_s30 = scalar_lea.hbm %s703_s2, %s358_s25  ;;  %s661_s27 = int_to_ptr.vmem [resolvable:$true] %s272_s27 }
  0x3b   : > { %159 = vperm.xlu0 %436, %v155_v3   ;;  %168 = vperm.xlu1 %438, %v155_v3   ;;  %s259_s3 = scalar_lea.sflag [#allocation4], %s147_s23  ;;  %s473_s13 = scalar_lea.vmem %s661_s27, 64 }
  0x3c   : > { %369 = vmatpush3.bf16.msra.mxu0 %v442_v5  ;;  %p474_p6 = scmp.ne.s32.totalorder %s661_s27, %s473_s13  ;;  %p714_p9 = scmp.ne.s32.totalorder %s707_s19, 0 }
  0x3d   : > { %370 = vmatprep.subr.bf16.mxu0 %v546_v2  ;;  %s550_s4 = smov [#allocation5]  }
  0x3e   : > { %p475_p10 = pnand %p474_p6, %p714_p9  ;;  %s477_s5 = sshll.u32 %s550_s4, 4  ;;  %s478_s5 = int_to_ptr.vmem [resolvable:$false] %s477_s5 }
  0x3f   : > { %437 = vset.pattern.permute.xlu0 %v547_v6  ;;  %439 = vset.pattern.permute.xlu1 %v548_v7  ;;  %s479_s6 = scalar_lea.vmem %s478_s5, 128  ;;  %p480_p2 = scmp.lt.s32.totalorder %s661_s27, %s478_s5 }
  0x40   : > { %163 = vperm.xlu0 %437, %v155_v3   ;;  %173 = vperm.xlu1 %439, %v155_v3   ;;  %p476_p12 = pneg %p475_p10  ;;  %p481_p3 = scmp.lt.s32.totalorder %s479_s6, %s473_s13 }
  0x41   : > { %371 = vmatpush3.bf16.msra.mxu0 %v443_v8 }
  0x42   : > { %372 = vmatprep.subr.bf16.mxu0 %v546_v2  ;;  %p482_p4 = por %p481_p3, %p480_p2 }
  0x44   : > { %440 = vset.pattern.permute.xlu0 %v548_v7  ;;  %p483_p7 = pnand %p482_p4, %p476_p12 }
  0x45   : > { %373 = vmatpush3.bf16.msra.mxu0 %v444_v9 }
  0xba   : > { %v160_v11 = vpop.permute.xlu0 %159  ;;  %v169_v12 = vpop.permute.xlu1 %168 }
  0xbb   : > { %vm161_vm1 = vcmp.eq.s32.totalorder %v157_v13, %v160_v11  ;;  %vm170_vm4 = vcmp.eq.s32.totalorder %v157_v13, %v169_v12 }
  0xbf   : > { %v164_v14 = vpop.permute.xlu0 %163  ;;  %v174_v15 = vpop.permute.xlu1 %173 }
  0xc0   : > { %vm165_vm2 = vcmp.eq.s32.totalorder %v157_v13, %v164_v14  ;;  %vm175_vm3 = vcmp.eq.s32.totalorder %v157_v13, %v174_v15 }
  0xc1   : > { %vm166_vm5 = vmor %vm161_vm1, %vm165_vm2 }
  0xc2   : > { %vm171_vm6 = vmor %vm166_vm5, %vm170_vm4 }
  0xc3   : > { %vm176_vm7 = vmor %vm171_vm6, %vm175_vm3 }
  0xc4   : > { %v351_v16 = vsel %vm176_vm7, 1.0, %v546_v2 }
  0xc5   : > { %v179_v17 = vpack.c.bf16 %v351_v16, %v351_v16 }
  0xc7   : > { %375 = vmatmul.mubr.msk.bf16.vlgmr.msra.gmra.mrb[0].mxu0 %vm212_vm8, %v179_v17 }
 0x19a   : > { %v250_v18 = vpop.f32.mrb[0].mxu0 }
 0x19b   : > { %v256_v19 = vpack.c.bf16 %v250_v18, %v250_v18  ;;  %v376_v20 = vpop.f32.mrb[1].mxu0 }
 0x19c   : > { %v253_v21 = vpop.f32.mrb[2].mxu0 }
 0x19d   : > { %257 = vst [vmem:[%s149_s26] sm:$0xf] %v256_v19  ;;  %v377_v22 = vpop.f32.mrb[3].mxu0 }
 0x19e   : > { %486 = shalt.err (!%p483_p7)
}
 0x19f   : > { %s487_s7 = scalar_lea.hbm %s659_s30, 64  ;;  %s491_s16 = scalar_lea.hbm %s703_s2, 128 }
 0x1a0   : > { %p488_p8 = scmp.ne.s32.totalorder %s659_s30, %s487_s7  ;;  %p492_p1 = scmp.lt.u32.totalorder %s659_s30, %s703_s2 }
 0x1a1   : > { %p493_p0 = scmp.lt.u32.totalorder %s491_s16, %s487_s7  ;;  %p495_p6 = scmp.lt.u32.totalorder %s487_s7, %s659_s30 }
 0x1a2   : > { %p489_p11 = pnand %p488_p8, %p714_p9 }
 0x1a3   : > { %p494_p5 = por %p493_p0, %p492_p1 }
 0x1a4   : > { %p490_p13 = pneg %p489_p11 }
 0x1a5   : > { %p496_p10 = por %p495_p6, %p494_p5 }
 0x1a7   : > { %p497_p12 = pnand %p496_p10, %p490_p13 }
 0x1a9   : > { %500 = shalt.err (!%p497_p12)
}
 0x1aa   : > { %382 = dma.vmem_to_hbm [thread:$0]  (%p714_p9), %s661_s27, 64, %s659_s30, %s259_s3  }
 0x1ab PF: > { %p394_p2 = scmp.ge.s32.totalorder %s539_s12, 2  ;;  %s284_s22 = sand.u32 1, %s527_s9  }
 0x1ac   : > { %p715_p3 = scmp.ne.s32.totalorder %s708_s20, 0  ;;  %s285_s23 = scalar_lea.sflag [#allocation4], %s284_s22 }
 0x1ae   : > { %p389_p4 = pnand %p394_p2, %p715_p3 }
 0x1b0   : > { %522 = dma.done.wait (!%p389_p4), %s285_s23, 64  }
 0x1b1   : > { %524 = vsyncadd (!%p389_p4), %s285_s23, 4294967232  ;;  %p13_p7 = scmp.ge.s32.totalorder %s591_s15, 4   ;;  %s716_s9 = smov %s531_s10 }
 0x1b2   : > { %s717_s10 = smov %s535_s11  ;;  %s718_s11 = smov %s602_s18 }
 0x1b3   : > { %s719_s12 = smov %s591_s15  ;;  %15 = sbr.rel (!%p13_p7) target bundleno = 4 (0x4), region = 68 }
 0x1ba   :  { %290 = vsyncpa [#allocation3], 1 }
 0x1bb   :  { %292 = vsyncpa [#allocation3 + $0x1], 1 }
 0x1bc   :  { %293 = vsyncpa [#allocation4], 1 }
 0x1bd   :  { %295 = vsyncpa [#allocation4 + $0x1], 1 }

</bundles_post_ra>
